<compile_context>
chip_gen: v6e
topology: v6e:2x2x1
jax: 0.10.0
libtpu: 0.0.40
codegen_flags: <defaults>
</compile_context>

<pallas_src>
import functools

import jax
import jax.numpy as jnp
from jax.experimental import pallas as pl
from jax.experimental.pallas import tpu as pltpu


LANE = 128  # lane width / MXU tile granularity


def _round_up(n, m):
    return ((n + m - 1) // m) * m


def _pad2d(x, rows, cols):
    """Zero-pad a 2-D array up to (rows, cols)."""
    pr, pc = rows - x.shape[0], cols - x.shape[1]
    if pr == 0 and pc == 0:
        return x
    return jnp.pad(x, ((0, pr), (0, pc)))


def _choose_tb(bp, tb_max=512):
    """Largest batch tile up to tb_max; keep >=2 grid steps when the batch is
    big enough (feeds both v7x TensorCores; harmless on v5e/v6e)."""
    tb = max(128, _round_up((bp + 1) // 2, 8))
    return min(tb, tb_max, bp)


def _dqn_kernel(x_ref, w1_ref, b1_ref, w2_ref, b2_ref, w3_ref, b3_ref, out_ref):
    # x: (tb, S) f32 streamed per batch tile; weights/biases stay VMEM-resident
    # across grid steps (constant index_maps).
    x = x_ref[...]
    w1 = w1_ref[...]                             # (S, Hp) f32

    # Layer 1: S (= state_dim) is tiny, so use S broadcast FMAs on the VPU
    # instead of a lane-padded degenerate-K MXU matmul.
    h1 = x[:, 0:1] * w1[0:1, :]
    for s in range(1, x.shape[1]):               # static unroll, S is small
        h1 = h1 + x[:, s:s + 1] * w1[s:s + 1, :]
    h1 = jnp.maximum(h1 + b1_ref[...], 0.0)      # f32 bias-add / ReLU

    # Layer 2: bf16 operands on the MXU, f32 accumulation.
    h2 = jnp.dot(h1.astype(jnp.bfloat16), w2_ref[...],
                 preferred_element_type=jnp.float32) + b2_ref[...]
    h2 = jnp.maximum(h2, 0.0)

    # Layer 3: lane-dense matmul against the (Hp, Ap)-padded w3, then slice to
    # the real action columns so only (tb, A) is written back to HBM.
    q = jnp.dot(h2.astype(jnp.bfloat16), w3_ref[...],
                preferred_element_type=jnp.float32)
    a = out_ref.shape[-1]
    out_ref[...] = (q[:, :a] + b3_ref[...]).astype(out_ref.dtype)


def prepare_dqn_params(params):
    """One-time layout prep (hoisted out of the per-call path):
    pad hidden/action dims to lane multiples, cast MXU-resident weights to bf16."""
    w1, b1 = params["w1"], params["b1"]
    w2, b2 = params["w2"], params["b2"]
    w3, b3 = params["w3"], params["b3"]
    S, H = w1.shape
    A = w3.shape[1]
    Hp = _round_up(H, LANE)
    Ap = _round_up(A, LANE)
    return {
        "w1": _pad2d(w1.astype(jnp.float32), S, Hp),                 # (S, Hp)  f32
        "b1": _pad2d(b1.astype(jnp.float32).reshape(1, H), 1, Hp),   # (1, Hp)  f32
        "w2": _pad2d(w2, Hp, Hp).astype(jnp.bfloat16),               # (Hp, Hp) bf16
        "b2": _pad2d(b2.astype(jnp.float32).reshape(1, H), 1, Hp),   # (1, Hp)  f32
        "w3": _pad2d(w3, Hp, Ap).astype(jnp.bfloat16),               # (Hp, Ap) bf16
        "b3": b3.astype(jnp.float32).reshape(1, A),                  # (1, A)   f32
    }


@functools.partial(jax.jit, static_argnames=("tb",))
def dqn_forward(state, prepared, *, tb=None):
    """state: [B, state_dim] f32; prepared: output of prepare_dqn_params."""
    w1, b1 = prepared["w1"], prepared["b1"]
    w2, b2 = prepared["w2"], prepared["b2"]
    w3, b3 = prepared["w3"], prepared["b3"]

    B, S = state.shape
    Hp = w1.shape[1]
    A = b3.shape[1]           # real action dim (output width)

    # Per-call work is only the (tiny) batch pad; feature dims are untouched.
    Bp0 = _round_up(B, 8)
    tb = _choose_tb(Bp0) if tb is None else min(tb, Bp0)
    Bp = _round_up(Bp0, tb)
    xp = state.astype(jnp.float32)
    if Bp != B:
        xp = jnp.pad(xp, ((0, Bp - B), (0, 0)))

    grid = (Bp // tb,)
    # Constant index_map -> weights/biases single-buffered, VMEM-resident.
    resident = lambda r, c: pl.BlockSpec((r, c), lambda i: (0, 0))

    flops = 2 * Bp * (S * Hp + Hp * Hp + Hp * w3.shape[1])
    bytes_accessed = (
        Bp * S * 4 + Bp * A * 4
        + sum(int(v.size) * v.dtype.itemsize for v in (w1, b1, w2, b2, w3, b3)))

    out = pl.pallas_call(
        _dqn_kernel,
        out_shape=jax.ShapeDtypeStruct((Bp, A), jnp.float32),
        grid=grid,
        in_specs=[
            pl.BlockSpec((tb, S), lambda i: (i, 0)),      # x: batch-tiled, real width
            resident(S, Hp), resident(1, Hp),             # w1, b1
            resident(Hp, Hp), resident(1, Hp),            # w2, b2
            resident(Hp, w3.shape[1]), resident(1, A),    # w3 (lane-padded), b3 (real)
        ],
        out_specs=pl.BlockSpec((tb, A), lambda i: (i, 0)),   # real-width output store
        compiler_params=pltpu.CompilerParams(
            dimension_semantics=("parallel",)),
        cost_estimate=pl.CostEstimate(
            flops=flops, transcendentals=0, bytes_accessed=bytes_accessed),
    )(xp, w1, b1, w2, b2, w3, b3)

    return out[:B] if Bp != B else out


def init_dqn_params(key, state_dim, action_dim, hidden_dim):
    """PyTorch nn.Linear-style init (U[-1/sqrt(fan_in), 1/sqrt(fan_in)]);
    weights stored transposed as [in, out] so the kernel computes x @ W + b."""
    ks = jax.random.split(key, 6)

    def linear(kw, kb, fan_in, fan_out):
        bound = 1.0 / jnp.sqrt(jnp.float32(fan_in))
        w = jax.random.uniform(kw, (fan_in, fan_out), jnp.float32, -bound, bound)
        b = jax.random.uniform(kb, (1, fan_out), jnp.float32, -bound, bound)
        return w, b

    w1, b1 = linear(ks[0], ks[1], state_dim, hidden_dim)
    w2, b2 = linear(ks[2], ks[3], hidden_dim, hidden_dim)
    w3, b3 = linear(ks[4], ks[5], hidden_dim, action_dim)
    return {"w1": w1, "b1": b1, "w2": w2, "b2": b2, "w3": w3, "b3": b3}


def dqn_reference(state, p):
    """Pure-JAX reference with the same numeric contract as the kernel
    (f32 layer 1 via FMAs, bf16 operands / f32 accumulation for layers 2-3)."""
    w1 = p["w1"]
    h1 = state[:, 0:1] * w1[0:1, :]
    for s in range(1, state.shape[1]):
        h1 = h1 + state[:, s:s + 1] * w1[s:s + 1, :]
    h1 = jnp.maximum(h1 + p["b1"], 0.0)

    def mm(a, w):
        return jnp.dot(a.astype(jnp.bfloat16), w.astype(jnp.bfloat16),
                       preferred_element_type=jnp.float32)

    h2 = jnp.maximum(mm(h1, p["w2"]) + p["b2"], 0.0)
    return mm(h2, p["w3"]) + p["b3"]


if __name__ == "__main__":
    # Shapes implied by the module / env: state_dim=2 (Box shape (2,)),
    # action_dim=2 (Discrete(2)), hidden_dim=256 (module default).
    # Batch 256 so the batch grid (tb=128 -> 2 steps) is exercised.
    batch, state_dim, action_dim, hidden_dim = 256, 2, 2, 256

    key = jax.random.PRNGKey(0)
    k_params, k_state = jax.random.split(key)
    params = init_dqn_params(k_params, state_dim, action_dim, hidden_dim)
    prepared = prepare_dqn_params(params)   # one-time pad/cast, NOT per forward call
    state = jax.random.uniform(k_state, (batch, state_dim), jnp.float32, 0.0, 100.0)

    q = dqn_forward(state, prepared)
    q = jax.block_until_ready(q)

    q_ref = dqn_reference(state, params)
    assert q.shape == (batch, action_dim)
    err = float(jnp.max(jnp.abs(q - q_ref)))
    scale = float(jnp.max(jnp.abs(q_ref))) + 1e-6
    assert err <= 5e-3 * scale + 1e-2, (err, scale)
    print("KERNEL_OK")
</pallas_src>

<mosaic_0001>
module attributes {stable_mosaic.version = 11 : i64} {
  func.func @_dqn_kernel(%arg0: i32, %arg1: memref<128x2xf32, #tpu.memory_space<vmem>>, %arg2: memref<2x256xf32, #tpu.memory_space<vmem>>, %arg3: memref<1x256xf32, #tpu.memory_space<vmem>>, %arg4: memref<256x256xbf16, #tpu.memory_space<vmem>>, %arg5: memref<1x256xf32, #tpu.memory_space<vmem>>, %arg6: memref<256x128xbf16, #tpu.memory_space<vmem>>, %arg7: memref<1x2xf32, #tpu.memory_space<vmem>>, %arg8: memref<128x2xf32, #tpu.memory_space<vmem>>) attributes {dimension_semantics = [#tpu.dimension_semantics<parallel>], iteration_bounds = array<i64: 2>, scalar_prefetch = 0 : i64, scratch_operands = 0 : i64, tpu.core_type = #tpu.core_type<tc>, window_params = [{transform_indices = @transform_0, window_bounds = array<i64: 128, 2>}, {pipeline_mode = #tpu.pipeline_mode<synchronous>, transform_indices = @transform_1, window_bounds = array<i64: 2, 256>}, {pipeline_mode = #tpu.pipeline_mode<synchronous>, transform_indices = @transform_2, window_bounds = array<i64: 1, 256>}, {pipeline_mode = #tpu.pipeline_mode<synchronous>, transform_indices = @transform_3, window_bounds = array<i64: 256, 256>}, {pipeline_mode = #tpu.pipeline_mode<synchronous>, transform_indices = @transform_4, window_bounds = array<i64: 1, 256>}, {pipeline_mode = #tpu.pipeline_mode<synchronous>, transform_indices = @transform_5, window_bounds = array<i64: 256, 128>}, {pipeline_mode = #tpu.pipeline_mode<synchronous>, transform_indices = @transform_6, window_bounds = array<i64: 1, 2>}, {transform_indices = @transform_7, window_bounds = array<i64: 128, 2>}]} {
    %c0 = arith.constant 0 : index
    %c0_0 = arith.constant 0 : index
    %0 = vector.load %arg1[%c0, %c0_0] : memref<128x2xf32, #tpu.memory_space<vmem>>, vector<128x2xf32>
    %c0_1 = arith.constant 0 : index
    %c0_2 = arith.constant 0 : index
    %1 = vector.load %arg2[%c0_1, %c0_2] : memref<2x256xf32, #tpu.memory_space<vmem>>, vector<2x256xf32>
    %2 = vector.extract_strided_slice %0 {offsets = [0, 0], sizes = [128, 1], strides = [1, 1]} : vector<128x2xf32> to vector<128x1xf32>
    %3 = vector.extract_strided_slice %1 {offsets = [0, 0], sizes = [1, 256], strides = [1, 1]} : vector<2x256xf32> to vector<1x256xf32>
    %4 = vector.broadcast %2 : vector<128x1xf32> to vector<128x256xf32>
    %5 = vector.broadcast %3 : vector<1x256xf32> to vector<128x256xf32>
    %6 = arith.mulf %4, %5 : vector<128x256xf32>
    %7 = vector.extract_strided_slice %0 {offsets = [0, 1], sizes = [128, 1], strides = [1, 1]} : vector<128x2xf32> to vector<128x1xf32>
    %8 = vector.extract_strided_slice %1 {offsets = [1, 0], sizes = [1, 256], strides = [1, 1]} : vector<2x256xf32> to vector<1x256xf32>
    %9 = vector.broadcast %7 : vector<128x1xf32> to vector<128x256xf32>
    %10 = vector.broadcast %8 : vector<1x256xf32> to vector<128x256xf32>
    %11 = arith.mulf %9, %10 : vector<128x256xf32>
    %12 = arith.addf %6, %11 : vector<128x256xf32>
    %c0_3 = arith.constant 0 : index
    %c0_4 = arith.constant 0 : index
    %13 = vector.load %arg3[%c0_3, %c0_4] : memref<1x256xf32, #tpu.memory_space<vmem>>, vector<1x256xf32>
    %14 = vector.broadcast %13 : vector<1x256xf32> to vector<128x256xf32>
    %15 = arith.addf %12, %14 : vector<128x256xf32>
    %cst = arith.constant 0.000000e+00 : f32
    %16 = vector.broadcast %cst : f32 to vector<128x256xf32>
    %17 = arith.maximumf %15, %16 : vector<128x256xf32>
    %18 = arith.truncf %17 : vector<128x256xf32> to vector<128x256xbf16>
    %c0_5 = arith.constant 0 : index
    %c0_6 = arith.constant 0 : index
    %19 = vector.load %arg4[%c0_5, %c0_6] : memref<256x256xbf16, #tpu.memory_space<vmem>>, vector<256x256xbf16>
    %cst_7 = arith.constant dense<0.000000e+00> : vector<128x256xf32>
    %20 = tpu.matmul %18, %19, %cst_7 {dimension_numbers = #tpu.dot_dimension_numbers<[1], [0], [0], [1], [0, 0, 1, 1], [], []>} : vector<128x256xbf16>, vector<256x256xbf16>, vector<128x256xf32> -> vector<128x256xf32>
    %c0_8 = arith.constant 0 : index
    %c0_9 = arith.constant 0 : index
    %21 = vector.load %arg5[%c0_8, %c0_9] : memref<1x256xf32, #tpu.memory_space<vmem>>, vector<1x256xf32>
    %22 = vector.broadcast %21 : vector<1x256xf32> to vector<128x256xf32>
    %23 = arith.addf %20, %22 : vector<128x256xf32>
    %cst_10 = arith.constant 0.000000e+00 : f32
    %24 = vector.broadcast %cst_10 : f32 to vector<128x256xf32>
    %25 = arith.maximumf %23, %24 : vector<128x256xf32>
    %26 = arith.truncf %25 : vector<128x256xf32> to vector<128x256xbf16>
    %c0_11 = arith.constant 0 : index
    %c0_12 = arith.constant 0 : index
    %27 = vector.load %arg6[%c0_11, %c0_12] : memref<256x128xbf16, #tpu.memory_space<vmem>>, vector<256x128xbf16>
    %cst_13 = arith.constant dense<0.000000e+00> : vector<128x128xf32>
    %28 = tpu.matmul %26, %27, %cst_13 {dimension_numbers = #tpu.dot_dimension_numbers<[1], [0], [0], [1], [0, 0, 1, 1], [], []>} : vector<128x256xbf16>, vector<256x128xbf16>, vector<128x128xf32> -> vector<128x128xf32>
    %29 = vector.extract_strided_slice %28 {offsets = [0, 0], sizes = [128, 2], strides = [1, 1]} : vector<128x128xf32> to vector<128x2xf32>
    %c0_14 = arith.constant 0 : index
    %c0_15 = arith.constant 0 : index
    %30 = vector.load %arg7[%c0_14, %c0_15] : memref<1x2xf32, #tpu.memory_space<vmem>>, vector<1x2xf32>
    %31 = vector.broadcast %30 : vector<1x2xf32> to vector<128x2xf32>
    %32 = arith.addf %29, %31 : vector<128x2xf32>
    %c0_16 = arith.constant 0 : index
    %c0_17 = arith.constant 0 : index
    %33 = vector.load %arg8[%c0_16, %c0_17] : memref<128x2xf32, #tpu.memory_space<vmem>>, vector<128x2xf32>
    tpu.vector_store %arg8[%c0_16, %c0_17], %32 {strides = array<i32>} : memref<128x2xf32, #tpu.memory_space<vmem>>, vector<128x2xf32>,
    return
  }
  func.func @transform_0(%arg0: i32) -> (i32, i32) {
    %c0_i32 = arith.constant 0 : i32
    %c0_i32_0 = arith.constant 0 : i32
    return %arg0, %c0_i32 : i32, i32
  }
  func.func @transform_1(%arg0: i32) -> (i32, i32) {
    %c0_i32 = arith.constant 0 : i32
    %c0_i32_0 = arith.constant 0 : i32
    %c0_i32_1 = arith.constant 0 : i32
    return %c0_i32, %c0_i32_0 : i32, i32
  }
  func.func @transform_2(%arg0: i32) -> (i32, i32) {
    %c0_i32 = arith.constant 0 : i32
    %c0_i32_0 = arith.constant 0 : i32
    %c0_i32_1 = arith.constant 0 : i32
    return %c0_i32, %c0_i32_0 : i32, i32
  }
  func.func @transform_3(%arg0: i32) -> (i32, i32) {
    %c0_i32 = arith.constant 0 : i32
    %c0_i32_0 = arith.constant 0 : i32
    %c0_i32_1 = arith.constant 0 : i32
    return %c0_i32, %c0_i32_0 : i32, i32
  }
  func.func @transform_4(%arg0: i32) -> (i32, i32) {
    %c0_i32 = arith.constant 0 : i32
    %c0_i32_0 = arith.constant 0 : i32
    %c0_i32_1 = arith.constant 0 : i32
    return %c0_i32, %c0_i32_0 : i32, i32
  }
  func.func @transform_5(%arg0: i32) -> (i32, i32) {
    %c0_i32 = arith.constant 0 : i32
    %c0_i32_0 = arith.constant 0 : i32
    %c0_i32_1 = arith.constant 0 : i32
    return %c0_i32, %c0_i32_0 : i32, i32
  }
  func.func @transform_6(%arg0: i32) -> (i32, i32) {
    %c0_i32 = arith.constant 0 : i32
    %c0_i32_0 = arith.constant 0 : i32
    %c0_i32_1 = arith.constant 0 : i32
    return %c0_i32, %c0_i32_0 : i32, i32
  }
  func.func @transform_7(%arg0: i32) -> (i32, i32) {
    %c0_i32 = arith.constant 0 : i32
    %c0_i32_0 = arith.constant 0 : i32
    return %arg0, %c0_i32 : i32, i32
  }
}

</mosaic_0001>

<bundles_post_ra>
// kernel: dqn_forward.1
= control target key start
LH: loop header
LB: loop body
LE: loop exit
PB: predicated region body
PF: predicated region fallthrough
CT: control target
= control target key end

     0   :  { %12 = vsyncpa [#allocation3], 0  ;;  %s1699_s24 = smov 0   ;;  %s2101_s0 = inlined_call_operand.vmem [shape: f32[256,2], index: 0, kind: input, shape index: {}]   ;;  %s2102_s1 = inlined_call_operand.vmem [shape: f32[2,256], index: 1, kind: input, shape index: {}]   ;;  %s2103_s2 = inlined_call_operand.vmem [shape: f32[1,256], index: 2, kind: input, shape index: {}]   ;;  %s2104_s3 = inlined_call_operand.vmem [shape: bf16[256,256], index: 3, kind: input, shape index: {}]   ;;  %s2105_s4 = inlined_call_operand.vmem [shape: f32[1,256], index: 4, kind: input, shape index: {}]   ;;  %s2106_s5 = inlined_call_operand.hbm [shape: bf16[256,128], index: 5, kind: input, shape index: {}]   ;;  %s2107_s6 = inlined_call_operand.vmem [shape: f32[1,2], index: 6, kind: input, shape index: {}]   ;;  %s2108_s7 = inlined_call_operand.vmem [shape: f32[256,2], index: 7, kind: output, shape index: {}]  }
   0x1 LB: > { %s1382_s25 = sadd.s32 4294967295, %s1652_s24   ;;  %p1384_p0 = scmp.ge.s32.totalorder %s1652_s24, 1  ;;  %s1652_s24 = sphi %s1699_s24, %s18_s24  }
   0x2   : > { %p201_p1 = scmp.lt.s32.totalorder %s1652_s24, 3  ;;  %s1654_s26 = smov [#allocation2]  }
   0x3   : > { %s225_s27 = sshll.u32 %s1654_s26, 4  ;;  %p1711_p3 = scmp.eq.s32.totalorder %s1382_s25, 0  ;;  %s226_s27 = int_to_ptr.vmem [resolvable:$true] %s225_s27 }
   0x4   : > { %p1707_p2 = pnand %p1384_p0, %p201_p1  ;;  %s1627_s30 = scalar_lea.vmem %s226_s27, 2048 }
   0x5   : > { %p1628_p7 = scmp.ne.s32.totalorder %s226_s27, %s1627_s30  ;;  %p1635_p10 = scmp.lt.s32.totalorder %s226_s27, %s226_s27 }
   0x6   : > { %p1512_p4 = pneg %p1707_p2  ;;  %p1636_p11 = scmp.lt.s32.totalorder %s1627_s30, %s1627_s30 }
   0x8   : > { %p1513_p5 = pnand %p1711_p3, %p1512_p4  ;;  %p1637_p12 = por %p1636_p11, %p1635_p10 }
   0xa   : > { %p1618_p6 = pneg %p1513_p5 }
   0xc   : > { %p1630_p8 = pnand %p1628_p7, %p1618_p6 }
   0xe   : > { %p1631_p9 = pneg %p1630_p8 }
  0x10   : > { %p1638_p13 = pnand %p1637_p12, %p1631_p9 }
  0x12   : > { %1641 = shalt.err (!%p1638_p13)
}
  0x13   : > { %s1655_s8 = smov 64   ;;  %s1656_s9 = smov 4  }
  0x14   : > { %1515 = dma.hbm_to_vmem [thread:$0]  (!%p1513_p5), %s2106_s5, 2048, %s226_s27, [#allocation3], %s1655_s8, %s1655_s8, %s1656_s9  }
  0x15   : > { %253 = sbr.rel (%p1707_p2) target bundleno = 665 (0x299), region = 48 }
  0x1a   : > { %1647 = dma.done.wait (%p1711_p3), [#allocation3], 2048  }
  0x1b   : > { %1649 = vsyncadd (%p1711_p3), [#allocation3], 4294965248  ;;  %s1389_s12 = sshll.u32 %s1382_s25, 4  ;;  %v1657_v0 = vmov 1   ;;  %v1658_v1 = vmov 0   ;;  %v1600_v50 = vld [vmem:[#allocation2 + $0x78] sm:$0xff]   ;;  %v396_v57 = vlaneseq }
  0x1c   : > { %1532 = vset.pattern.permute.xlu1 %v1657_v0  ;;  %1531 = vset.pattern.permute.xlu0 %v1658_v1  ;;  %p286_p0 = scmp.lt.s32.totalorder %s1389_s12, 31  ;;  %v1552_v5 = vld [vmem:[%s2104_s3 + $0x74] ss:$8 sps:$4 sm:$0xff]   ;;  %v1554_v6 = vld [vmem:[%s2104_s3 + $0x70] ss:$8 sps:$4 sm:$0xff]   ;;  %v1604_v54 = vld [vmem:[#allocation2 + $0x68] sm:$0xff]  }
  0x1d   : > { %888 = vmatprep.subr.bf16.mxu0 %v1552_v5  ;;  %v1555_v8 = vld [vmem:[%s2104_s3 + $0x64] ss:$8 sps:$4 sm:$0xff]   ;;  %v1557_v9 = vld [vmem:[%s2104_s3 + $0x60] ss:$8 sps:$4 sm:$0xff]   ;;  %v1558_v10 = vld [vmem:[%s2104_s3 + $0x54] ss:$8 sps:$4 sm:$0xff]   ;;  %1444 = vmatprep.subr.bf16.mxu1 %v1600_v50 }
  0x1e   : > { %s2112_s12 = smov (!%p286_p0, %s1389_s12), 31  ;;  %889 = vmatpush1.bf16.msra.mxu0 %v1554_v6  ;;  %v1560_v11 = vld [vmem:[%s2104_s3 + $0x50] ss:$8 sps:$4 sm:$0xff]   ;;  %v1561_v12 = vld [vmem:[%s2104_s3 + $0x44] ss:$8 sps:$4 sm:$0xff]   ;;  %v397_v60 = vshrl.u32 %v396_v57, 7 }
  0x1f   : > { %s1390_s13 = sshll.u32 %s2112_s12, 3  ;;  %890 = vmatprep.subr.bf16.mxu0 %v1555_v8  ;;  %v1563_v15 = vld [vmem:[%s2104_s3 + $0x40] ss:$8 sps:$4 sm:$0xff]   ;;  %v1564_v16 = vld [vmem:[%s2104_s3 + $0x34] ss:$8 sps:$4 sm:$0xff]   ;;  %vm1297_vm0 = vcmask 15360  }
  0x20   : > { %s1738_s16 = scalar_lea.vmem %s2101_s0, %s1390_s13  ;;  %v1566_v18 = vld [vmem:[%s2104_s3 + $0x30] ss:$8 sps:$4 sm:$0xff]   ;;  %v1567_v19 = vld [vmem:[%s2104_s3 + $0x24] ss:$8 sps:$4 sm:$0xff]   ;;  %v1569_v20 = vld [vmem:[%s2104_s3 + $0x20] ss:$8 sps:$4 sm:$0xff]   ;;  %s2048_s11 = scalar_lea.vmem %s2108_s7, %s1390_s13 }
  0x21   : > { %v298_v2 = vld [vmem:[%s1738_s16] sm:$0xff]  ;;  %v299_v3 = vld [vmem:[%s1738_s16 + $0x8] sm:$0xff]  ;;  %v300_v4 = vld [vmem:[%s1738_s16 + $0x10] sm:$0xff]  ;;  %v1871_v62 = vsub.s32 1, %v397_v60  ;;  %v516_v63 = vsub.s32 3, %v397_v60 }
  0x22   : > { %447 = vperm.xlu1 %1532, %v298_v2   ;;  %317 = vperm.xlu0 %1531, %v298_v2   ;;  %v301_v7 = vld [vmem:[%s1738_s16 + $0x18] sm:$0xff]  ;;  %v302_v13 = vld [vmem:[%s1738_s16 + $0x20] sm:$0xff]  ;;  %v304_v14 = vld [vmem:[%s1738_s16 + $0x30] sm:$0xff] }
  0x23   : > { %891 = vmatpush1.bf16.msra.mxu0 %v1557_v9  ;;  %v303_v17 = vld [vmem:[%s1738_s16 + $0x28] sm:$0xff]  ;;  %v1570_v21 = vld [vmem:[%s2104_s3 + $0x14] ss:$8 sps:$4 sm:$0xff]   ;;  %v1572_v23 = vld [vmem:[%s2104_s3 + $0x10] ss:$8 sps:$4 sm:$0xff]  }
  0x24   : > { %892 = vmatprep.subr.bf16.mxu0 %v1558_v10  ;;  %v307_v22 = vld [vmem:[%s1738_s16 + $0x48] sm:$0xff]  ;;  %v305_v25 = vld [vmem:[%s1738_s16 + $0x38] sm:$0xff]  ;;  %v308_v27 = vld [vmem:[%s1738_s16 + $0x50] sm:$0xff] }
  0x25   : > { %v1573_v24 = vld [vmem:[%s2104_s3 + $0x4] ss:$8 sps:$4 sm:$0xff]   ;;  %v1575_v26 = vld [vmem:[%s2104_s3] ss:$8 sps:$4 sm:$0xff]   ;;  %v1576_v28 = vld [vmem:[%s2104_s3 + $0xf4] ss:$8 sps:$4 sm:$0xff]  }
  0x26   : > { %451 = vperm.xlu1 %1532, %v299_v3   ;;  %322 = vperm.xlu0 %1531, %v299_v3   ;;  %v1578_v29 = vld [vmem:[%s2104_s3 + $0xf0] ss:$8 sps:$4 sm:$0xff]   ;;  %v1579_v30 = vld [vmem:[%s2104_s3 + $0xe4] ss:$8 sps:$4 sm:$0xff]   ;;  %v1581_v31 = vld [vmem:[%s2104_s3 + $0xe0] ss:$8 sps:$4 sm:$0xff]  }
  0x27   : > { %893 = vmatpush1.bf16.msra.mxu0 %v1560_v11  ;;  %v306_v32 = vld [vmem:[%s1738_s16 + $0x40] sm:$0xff]  ;;  %v1582_v33 = vld [vmem:[%s2104_s3 + $0xd4] ss:$8 sps:$4 sm:$0xff]   ;;  %v311_v34 = vld [vmem:[%s1738_s16 + $0x68] sm:$0xff] }
  0x28   : > { %894 = vmatprep.subr.bf16.mxu0 %v1561_v12  ;;  %v1584_v35 = vld [vmem:[%s2104_s3 + $0xd0] ss:$8 sps:$4 sm:$0xff]   ;;  %v1585_v37 = vld [vmem:[%s2104_s3 + $0xc4] ss:$8 sps:$4 sm:$0xff]   ;;  %v1587_v38 = vld [vmem:[%s2104_s3 + $0xc0] ss:$8 sps:$4 sm:$0xff]  }
  0x29   : > { %v312_v36 = vld [vmem:[%s1738_s16 + $0x70] sm:$0xff]  ;;  %v1591_v41 = vld [vmem:[%s2104_s3 + $0xa4] ss:$8 sps:$4 sm:$0xff]   ;;  %v309_v42 = vld [vmem:[%s1738_s16 + $0x58] sm:$0xff] }
  0x2a   : > { %1533 = vset.pattern.permute.xlu1 %v1658_v1  ;;  %327 = vperm.xlu0 %1531, %v300_v4   ;;  %v1588_v39 = vld [vmem:[%s2104_s3 + $0xb4] ss:$8 sps:$4 sm:$0xff]   ;;  %v1590_v40 = vld [vmem:[%s2104_s3 + $0xb0] ss:$8 sps:$4 sm:$0xff]   ;;  %v1593_v43 = vld [vmem:[%s2104_s3 + $0xa0] ss:$8 sps:$4 sm:$0xff]  }
  0x2b   : > { %332 = vperm.xlu1 %1533, %v301_v7   ;;  %895 = vmatpush1.bf16.msra.mxu0 %v1563_v15  ;;  %v1594_v44 = vld [vmem:[%s2104_s3 + $0x94] ss:$8 sps:$4 sm:$0xff]   ;;  %v1596_v45 = vld [vmem:[%s2104_s3 + $0x90] ss:$8 sps:$4 sm:$0xff]   ;;  %v1597_v46 = vld [vmem:[%s2104_s3 + $0x84] ss:$8 sps:$4 sm:$0xff]  }
  0x2c   : > { %896 = vmatprep.subr.bf16.mxu0 %v1564_v16  ;;  %v1599_v47 = vld [vmem:[%s2104_s3 + $0x80] ss:$8 sps:$4 sm:$0xff]   ;;  %v313_v49 = vld [vmem:[%s1738_s16 + $0x78] sm:$0xff]  ;;  %v1602_v52 = vld [vmem:[#allocation2 + $0x70] sm:$0xff]  }
  0x2d   : > { %v310_v48 = vld [vmem:[%s1738_s16 + $0x60] sm:$0xff]  ;;  %v1601_v51 = vld [vmem:[#allocation2 + $0x38] sm:$0xff]   ;;  %v1603_v53 = vld [vmem:[#allocation2 + $0x30] sm:$0xff]  }
  0x2e   : > { %1534 = vset.pattern.permute.xlu0 %v1657_v0  ;;  %1445 = vmatpush3.bf16.msra.mxu1 %v1601_v51  ;;  %v1605_v55 = vld [vmem:[#allocation2 + $0x28] sm:$0xff]   ;;  %v1606_v56 = vld [vmem:[#allocation2 + $0x60] sm:$0xff]   ;;  %v1608_v59 = vld [vmem:[#allocation2 + $0x58] sm:$0xff]  }
  0x2f   : > { %1535 = vset.pattern.permute.xlu1 %v1657_v0  ;;  %455 = vperm.xlu0 %1534, %v300_v4   ;;  %v1607_v58 = vld [vmem:[#allocation2 + $0x20] sm:$0xff]   ;;  %v1609_v61 = vld [vmem:[#allocation2 + $0x18] sm:$0xff]  }
  0x30   : > { %459 = vperm.xlu1 %1535, %v301_v7   ;;  %897 = vmatpush1.bf16.msra.mxu0 %v1566_v18  ;;  %v314_v2 = vld [vmem:[%s2102_s1] sm:$0xf] }
  0x31   : > { %898 = vmatprep.subr.bf16.mxu0 %v1567_v19  ;;  %1446 = vmatprep.subr.bf16.mxu1 %v1602_v52  ;;  %v513_v3 = vrot.slane %v314_v2, %v1871_v62  ;;  %v517_v4 = vrot.slane %v314_v2, %v516_v63  ;;  %v592_v12 = vld [vmem:[%s2103_s2] sm:$0x3] }
  0x32   : > { %1447 = vmatpush3.bf16.msra.mxu1 %v1603_v53 }
  0x33   : > { %471 = vperm.xlu0 %1534, %v304_v14   ;;  %1448 = vmatprep.subr.bf16.mxu1 %v1604_v54  ;;  %v1881_v7 = vrot.slane %v513_v3, %v1871_v62  ;;  %v1884_v8 = vrot.slane %v517_v4, %v1871_v62 }
  0x34   : > { %1536 = vset.pattern.permute.xlu1 %v1658_v1  ;;  %899 = vmatpush1.bf16.msra.mxu0 %v1569_v20 }
  0x35   : > { %337 = vperm.xlu1 %1536, %v302_v13   ;;  %900 = vmatprep.subr.bf16.mxu0 %v1570_v21 }
  0x36   : > { %1449 = vmatpush3.bf16.msra.mxu1 %v1605_v55 }
  0x37   : > { %1539 = vset.pattern.permute.xlu0 %v1658_v1  ;;  %1450 = vmatprep.subr.bf16.mxu1 %v1606_v56 }
  0x38   : > { %342 = vperm.xlu0 %1539, %v303_v17   ;;  %901 = vmatpush1.bf16.msra.mxu0 %v1572_v23  ;;  %v1903_v23 = vrot.slane %v592_v12, %v1871_v62 }
  0x39   : > { %1537 = vset.pattern.permute.xlu1 %v1657_v0  ;;  %902 = vmatprep.subr.bf16.mxu0 %v1573_v24 }
  0x3a   : > { %463 = vperm.xlu1 %1537, %v302_v13   ;;  %1451 = vmatpush3.bf16.msra.mxu1 %v1607_v58 }
  0x3b   : > { %1452 = vmatprep.subr.bf16.mxu1 %v1608_v59 }
  0x3c   : > { %347 = vperm.xlu0 %1539, %v304_v14   ;;  %903 = vmatpush1.bf16.msra.mxu0 %v1575_v26 }
  0x3d   : > { %904 = vmatprep.subr.bf16.mxu0 %v1576_v28 }
  0x3e   : > { %467 = vperm.xlu1 %1537, %v303_v17   ;;  %1453 = vmatpush3.bf16.msra.mxu1 %v1609_v61 }
  0x40   : > { %362 = vperm.xlu0 %1539, %v307_v22   ;;  %905 = vmatpush2.bf16.msra.mxu0 %v1578_v29 }
  0x41   : > { %906 = vmatprep.subr.bf16.mxu0 %v1579_v30 }
  0x42   : > { %1538 = vset.pattern.permute.xlu1 %v1658_v1 }
  0x43   : > { %352 = vperm.xlu1 %1538, %v305_v25  }
  0x44   : > { %1544 = vset.pattern.permute.xlu0 %v1657_v0  ;;  %907 = vmatpush2.bf16.msra.mxu0 %v1581_v31 }
  0x45   : > { %487 = vperm.xlu0 %1544, %v308_v27   ;;  %908 = vmatprep.subr.bf16.mxu0 %v1582_v33 }
  0x47   : > { %1540 = vset.pattern.permute.xlu1 %v1657_v0 }
  0x48   : > { %475 = vperm.xlu1 %1540, %v305_v25   ;;  %909 = vmatpush2.bf16.msra.mxu0 %v1584_v35 }
  0x49   : > { %1545 = vset.pattern.permute.xlu0 %v1658_v1  ;;  %910 = vmatprep.subr.bf16.mxu0 %v1585_v37 }
  0x4a   : > { %367 = vperm.xlu0 %1545, %v308_v27  }
  0x4c   : > { %1541 = vset.pattern.permute.xlu1 %v1658_v1  ;;  %911 = vmatpush2.bf16.msra.mxu0 %v1587_v38 }
  0x4d   : > { %357 = vperm.xlu1 %1541, %v306_v32   ;;  %912 = vmatprep.subr.bf16.mxu0 %v1588_v39 }
  0x4e   : > { %382 = vperm.xlu0 %1545, %v311_v34  }
  0x50   : > { %913 = vmatpush2.bf16.msra.mxu0 %v1590_v40 }
  0x51   : > { %1542 = vset.pattern.permute.xlu1 %v1657_v0  ;;  %914 = vmatprep.subr.bf16.mxu0 %v1591_v41 }
  0x52   : > { %479 = vperm.xlu1 %1542, %v306_v32   ;;  %387 = vperm.xlu0 %1545, %v312_v36  }
  0x54   : > { %915 = vmatpush2.bf16.msra.mxu0 %v1593_v43 }
  0x55   : > { %916 = vmatprep.subr.bf16.mxu0 %v1594_v44 }
  0x56   : > { %483 = vperm.xlu1 %1542, %v307_v22   ;;  %1550 = vset.pattern.permute.xlu0 %v1657_v0 }
  0x57   : > { %503 = vperm.xlu0 %1550, %v312_v36  }
  0x58   : > { %917 = vmatpush2.bf16.msra.mxu0 %v1596_v45 }
  0x59   : > { %918 = vmatprep.subr.bf16.mxu0 %v1597_v46 }
  0x5a   : > { %1543 = vset.pattern.permute.xlu1 %v1658_v1 }
  0x5b   : > { %372 = vperm.xlu1 %1543, %v309_v42  }
  0x5c   : > { %919 = vmatpush2.bf16.msra.mxu0 %v1599_v47 }
  0x5f   : > { %1546 = vset.pattern.permute.xlu1 %v1657_v0 }
  0x60   : > { %491 = vperm.xlu1 %1546, %v309_v42  }
  0x64   : > { %1547 = vset.pattern.permute.xlu1 %v1658_v1 }
  0x65   : > { %377 = vperm.xlu1 %1547, %v310_v48  }
  0x69   : > { %1548 = vset.pattern.permute.xlu1 %v1657_v0 }
  0x6a   : > { %495 = vperm.xlu1 %1548, %v310_v48  }
  0x6e   : > { %499 = vperm.xlu1 %1548, %v311_v34  }
  0x72   : > { %1549 = vset.pattern.permute.xlu1 %v1658_v1  ;;  %v402_v1 = vsub.s32 2, %v397_v60 }
  0x73   : > { %392 = vperm.xlu1 %1549, %v313_v49  }
  0x74   : > { %v403_v6 = vrot.slane %v314_v2, %v402_v1 }
  0x77   : > { %1551 = vset.pattern.permute.xlu1 %v1657_v0  ;;  %v1873_v0 = vsub.s32 0, %v397_v60 }
  0x78   : > { %507 = vperm.xlu1 %1551, %v313_v49  }
  0x79   : > { %v399_v5 = vrot.slane %v314_v2, %v1873_v0  ;;  %v1890_v10 = vrot.slane %v403_v6, %v1873_v0  ;;  %v1900_v18 = vrot.slane %v592_v12, %v1873_v0 }
  0x7b   : > { %v1887_v9 = vrot.slane %v399_v5, %v1873_v0 }
  0x9d   : > { %v448_v11 = vpop.permute.xlu1 %447  ;;  %v318_v13 = vpop.permute.xlu0 %317 }
  0x9e   : > { %v528_v14 = vmul.f32 %v1881_v7, %v448_v11  ;;  %v529_v15 = vmul.f32 %v1884_v8, %v448_v11  ;;  %v414_v16 = vmul.f32 %v1887_v9, %v318_v13  ;;  %v415_v17 = vmul.f32 %v1890_v10, %v318_v13 }
  0xa0   : > { %v560_v19 = vadd.f32 %v528_v14, %v414_v16  ;;  %v561_v20 = vadd.f32 %v529_v15, %v415_v17 }
  0xa1   : > { %v452_v21 = vpop.permute.xlu1 %451  ;;  %v323_v22 = vpop.permute.xlu0 %322 }
  0xa2   : > { %v530_v24 = vmul.f32 %v1881_v7, %v452_v21  ;;  %v531_v25 = vmul.f32 %v1884_v8, %v452_v21  ;;  %v416_v26 = vmul.f32 %v1887_v9, %v323_v22  ;;  %v417_v27 = vmul.f32 %v1890_v10, %v323_v22 }
  0xa3   : > { %v604_v28 = vadd.f32 %v1900_v18, %v560_v19  ;;  %v605_v32 = vadd.f32 %v1903_v23, %v561_v20 }
  0xa4   : > { %v562_v29 = vadd.f32 %v530_v24, %v416_v26  ;;  %v563_v30 = vadd.f32 %v531_v25, %v417_v27 }
  0xa5   : > { %v328_v31 = vpop.permute.xlu0 %327  ;;  %v636_v36 = vmax.f32 %v604_v28, 0.0  ;;  %v637_v40 = vmax.f32 %v605_v32, 0.0 }
  0xa6   : > { %v606_v33 = vadd.f32 %v1900_v18, %v562_v29  ;;  %v333_v34 = vpop.permute.xlu1 %332  ;;  %v607_v35 = vadd.f32 %v1903_v23, %v563_v30  ;;  %v418_v38 = vmul.f32 %v1887_v9, %v328_v31  ;;  %v419_v39 = vmul.f32 %v1890_v10, %v328_v31 }
  0xa7   : > { %v420_v48 = vmul.f32 %v1887_v9, %v333_v34  ;;  %v421_v49 = vmul.f32 %v1890_v10, %v333_v34 }
  0xa8   : > { %v638_v37 = vmax.f32 %v606_v33, 0.0  ;;  %v639_v41 = vmax.f32 %v607_v35, 0.0 }
  0xaa   : > { %v456_v42 = vpop.permute.xlu0 %455  ;;  %v668_v43 = vpack.c.bf16 %v638_v37, %v636_v36  ;;  %v669_v47 = vpack.c.bf16 %v639_v41, %v637_v40 }
  0xab   : > { %v460_v44 = vpop.permute.xlu1 %459  ;;  %v532_v45 = vmul.f32 %v1881_v7, %v456_v42  ;;  %v533_v46 = vmul.f32 %v1884_v8, %v456_v42 }
  0xac   : > { %v534_v50 = vmul.f32 %v1881_v7, %v460_v44  ;;  %v535_v51 = vmul.f32 %v1884_v8, %v460_v44  ;;  %920 = vmatprep.mubr.bf16.mxu0 %v669_v47 }
  0xad   : > { %v564_v52 = vadd.f32 %v532_v45, %v418_v38  ;;  %v565_v53 = vadd.f32 %v533_v46, %v419_v39  ;;  %921 = vmatmul.mubr.bf16.vlgmr.msra.gmra.mxu0 %v668_v43 }
  0xae   : > { %v566_v54 = vadd.f32 %v534_v50, %v420_v48  ;;  %v567_v55 = vadd.f32 %v535_v51, %v421_v49  ;;  %v472_v56 = vpop.permute.xlu0 %471 }
  0xaf   : > { %v608_v57 = vadd.f32 %v1900_v18, %v564_v52  ;;  %v609_v58 = vadd.f32 %v1903_v23, %v565_v53  ;;  %v540_v26 = vmul.f32 %v1881_v7, %v472_v56  ;;  %v541_v27 = vmul.f32 %v1884_v8, %v472_v56 }
  0xb0   : > { %v610_v59 = vadd.f32 %v1900_v18, %v566_v54  ;;  %v611_v60 = vadd.f32 %v1903_v23, %v567_v55  ;;  %v338_v61 = vpop.permute.xlu1 %337 }
  0xb1   : > { %v641_v63 = vmax.f32 %v609_v58, 0.0  ;;  %v640_v1 = vmax.f32 %v608_v57, 0.0  ;;  %v422_v12 = vmul.f32 %v1887_v9, %v338_v61  ;;  %v423_v13 = vmul.f32 %v1890_v10, %v338_v61 }
  0xb2   : > { %v643_v2 = vmax.f32 %v611_v60, 0.0  ;;  %v642_v3 = vmax.f32 %v610_v59, 0.0 }
  0xb3   : > { %v343_v6 = vpop.permute.xlu0 %342 }
  0xb4   : > { %v671_v4 = vpack.c.bf16 %v643_v2, %v641_v63  ;;  %v670_v5 = vpack.c.bf16 %v642_v3, %v640_v1  ;;  %v424_v19 = vmul.f32 %v1887_v9, %v343_v6  ;;  %v425_v20 = vmul.f32 %v1890_v10, %v343_v6 }
  0xb5   : > { %v464_v11 = vpop.permute.xlu1 %463 }
  0xb6   : > { %v536_v14 = vmul.f32 %v1881_v7, %v464_v11  ;;  %v537_v15 = vmul.f32 %v1884_v8, %v464_v11  ;;  %930 = vmatprep.mubr.bf16.mxu0 %v671_v4 }
  0xb7   : > { %931 = vmatmul.mubr.bf16.gmra.mxu0 %v670_v5  ;;  %v348_v21 = vpop.permute.xlu0 %347 }
  0xb8   : > { %v568_v16 = vadd.f32 %v536_v14, %v422_v12  ;;  %v569_v17 = vadd.f32 %v537_v15, %v423_v13  ;;  %v426_v28 = vmul.f32 %v1887_v9, %v348_v21  ;;  %v427_v29 = vmul.f32 %v1890_v10, %v348_v21 }
  0xb9   : > { %v468_v22 = vpop.permute.xlu1 %467 }
  0xba   : > { %v538_v24 = vmul.f32 %v1881_v7, %v468_v22  ;;  %v539_v25 = vmul.f32 %v1884_v8, %v468_v22  ;;  %v612_v30 = vadd.f32 %v1900_v18, %v568_v16  ;;  %v613_v31 = vadd.f32 %v1903_v23, %v569_v17 }
  0xbb   : > { %v572_v37 = vadd.f32 %v540_v26, %v426_v28  ;;  %v573_v38 = vadd.f32 %v541_v27, %v427_v29  ;;  %v363_v57 = vpop.permute.xlu0 %362 }
  0xbc   : > { %v570_v32 = vadd.f32 %v538_v24, %v424_v19  ;;  %v571_v33 = vadd.f32 %v539_v25, %v425_v20  ;;  %v645_v39 = vmax.f32 %v613_v31, 0.0  ;;  %v644_v41 = vmax.f32 %v612_v30, 0.0 }
  0xbd   : > { %v616_v45 = vadd.f32 %v1900_v18, %v572_v37  ;;  %v617_v46 = vadd.f32 %v1903_v23, %v573_v38  ;;  %v432_v15 = vmul.f32 %v1887_v9, %v363_v57  ;;  %v433_v16 = vmul.f32 %v1890_v10, %v363_v57 }
  0xbe   : > { %v614_v34 = vadd.f32 %v1900_v18, %v570_v32  ;;  %v615_v35 = vadd.f32 %v1903_v23, %v571_v33  ;;  %v353_v36 = vpop.permute.xlu1 %352 }
  0xbf   : > { %v428_v48 = vmul.f32 %v1887_v9, %v353_v36  ;;  %v429_v49 = vmul.f32 %v1890_v10, %v353_v36  ;;  %v649_v58 = vmax.f32 %v617_v46, 0.0  ;;  %v648_v59 = vmax.f32 %v616_v45, 0.0 }
  0xc0   : > { %v647_v40 = vmax.f32 %v615_v35, 0.0  ;;  %v646_v42 = vmax.f32 %v614_v34, 0.0  ;;  %v488_v2 = vpop.permute.xlu0 %487 }
  0xc1   : > { %v548_v21 = vmul.f32 %v1881_v7, %v488_v2  ;;  %v549_v22 = vmul.f32 %v1884_v8, %v488_v2 }
  0xc2   : > { %v673_v43 = vpack.c.bf16 %v647_v40, %v645_v39  ;;  %v672_v44 = vpack.c.bf16 %v646_v42, %v644_v41 }
  0xc3   : > { %v476_v47 = vpop.permute.xlu1 %475 }
  0xc4   : > { %v542_v50 = vmul.f32 %v1881_v7, %v476_v47  ;;  %v543_v51 = vmul.f32 %v1884_v8, %v476_v47  ;;  %940 = vmatprep.mubr.bf16.mxu0 %v673_v43 }
  0xc5   : > { %941 = vmatmul.mubr.bf16.gmra.mxu0 %v672_v44  ;;  %v368_v20 = vpop.permute.xlu0 %367 }
  0xc6   : > { %v574_v52 = vadd.f32 %v542_v50, %v428_v48  ;;  %v575_v53 = vadd.f32 %v543_v51, %v429_v49  ;;  %v434_v24 = vmul.f32 %v1887_v9, %v368_v20  ;;  %v435_v25 = vmul.f32 %v1890_v10, %v368_v20 }
  0xc8   : > { %v618_v54 = vadd.f32 %v1900_v18, %v574_v52  ;;  %v619_v55 = vadd.f32 %v1903_v23, %v575_v53  ;;  %v358_v56 = vpop.permute.xlu1 %357  ;;  %v580_v33 = vadd.f32 %v548_v21, %v434_v24  ;;  %v581_v34 = vadd.f32 %v549_v22, %v435_v25 }
  0xc9   : > { %v430_v4 = vmul.f32 %v1887_v9, %v358_v56  ;;  %v431_v5 = vmul.f32 %v1890_v10, %v358_v56  ;;  %v383_v50 = vpop.permute.xlu0 %382 }
  0xca   : > { %v651_v60 = vmax.f32 %v619_v55, 0.0  ;;  %v650_v61 = vmax.f32 %v618_v54, 0.0  ;;  %v624_v41 = vadd.f32 %v1900_v18, %v580_v33  ;;  %v625_v42 = vadd.f32 %v1903_v23, %v581_v34 }
  0xcc   : > { %v675_v63 = vpack.c.bf16 %v651_v60, %v649_v58  ;;  %v674_v1 = vpack.c.bf16 %v650_v61, %v648_v59  ;;  %v657_v54 = vmax.f32 %v625_v42, 0.0  ;;  %v656_v55 = vmax.f32 %v624_v41, 0.0  ;;  %v1613_v42 = vld [vmem:[#allocation2 + $0x8] sm:$0xff]  }
  0xcd   : > { %v480_v3 = vpop.permute.xlu1 %479  ;;  %v388_v60 = vpop.permute.xlu0 %387 }
  0xce   : > { %v544_v6 = vmul.f32 %v1881_v7, %v480_v3  ;;  %v545_v11 = vmul.f32 %v1884_v8, %v480_v3  ;;  %950 = vmatprep.mubr.bf16.mxu0 %v675_v63  ;;  %v442_v21 = vmul.f32 %v1887_v9, %v388_v60  ;;  %v443_v22 = vmul.f32 %v1890_v10, %v388_v60 }
  0xcf   : > { %951 = vmatmul.mubr.bf16.gmra.mxu0 %v674_v1 }
  0xd0   : > { %v576_v12 = vadd.f32 %v544_v6, %v430_v4  ;;  %v577_v13 = vadd.f32 %v545_v11, %v431_v5  ;;  %v440_v11 = vmul.f32 %v1887_v9, %v383_v50 }
  0xd1   : > { %v484_v14 = vpop.permute.xlu1 %483 }
  0xd2   : > { %v546_v17 = vmul.f32 %v1881_v7, %v484_v14  ;;  %v547_v19 = vmul.f32 %v1884_v8, %v484_v14  ;;  %v620_v26 = vadd.f32 %v1900_v18, %v576_v12  ;;  %v621_v27 = vadd.f32 %v1903_v23, %v577_v13 }
  0xd3   : > { %v441_v12 = vmul.f32 %v1890_v10, %v383_v50  ;;  %v1614_v50 = vld [vmem:[#allocation2 + $0x40] sm:$0xff]  }
  0xd4   : > { %v578_v28 = vadd.f32 %v546_v17, %v432_v15  ;;  %v579_v29 = vadd.f32 %v547_v19, %v433_v16  ;;  %v653_v35 = vmax.f32 %v621_v27, 0.0  ;;  %v652_v37 = vmax.f32 %v620_v26, 0.0  ;;  %v504_v15 = vpop.permute.xlu0 %503 }
  0xd5   : > { %v556_v24 = vmul.f32 %v1881_v7, %v504_v15  ;;  %v557_v25 = vmul.f32 %v1884_v8, %v504_v15 }
  0xd6   : > { %v622_v30 = vadd.f32 %v1900_v18, %v578_v28  ;;  %v623_v31 = vadd.f32 %v1903_v23, %v579_v29  ;;  %v373_v32 = vpop.permute.xlu1 %372  ;;  %v1610_v29 = vld [vmem:[#allocation2 + $0x50] sm:$0xff]  }
  0xd7   : > { %v436_v44 = vmul.f32 %v1887_v9, %v373_v32  ;;  %v437_v45 = vmul.f32 %v1890_v10, %v373_v32  ;;  %1454 = vmatprep.subr.bf16.mxu1 %v1610_v29 }
  0xd8   : > { %v655_v36 = vmax.f32 %v623_v31, 0.0  ;;  %v654_v38 = vmax.f32 %v622_v30, 0.0  ;;  %v1611_v30 = vld [vmem:[#allocation2 + $0x10] sm:$0xff]  }
  0xd9   : > { %1455 = vmatpush3.bf16.msra.mxu1 %v1611_v30 }
  0xda   : > { %v677_v39 = vpack.c.bf16 %v655_v36, %v653_v35  ;;  %v676_v40 = vpack.c.bf16 %v654_v38, %v652_v37  ;;  %v588_v35 = vadd.f32 %v556_v24, %v442_v21  ;;  %v589_v36 = vadd.f32 %v557_v25, %v443_v22 }
  0xdb   : > { %v492_v43 = vpop.permute.xlu1 %491 }
  0xdc   : > { %v550_v46 = vmul.f32 %v1881_v7, %v492_v43  ;;  %v551_v47 = vmul.f32 %v1884_v8, %v492_v43  ;;  %960 = vmatprep.mubr.bf16.mxu0 %v677_v39  ;;  %v1612_v39 = vld [vmem:[#allocation2 + $0x48] sm:$0xff]  }
  0xdd   : > { %961 = vmatmul.mubr.bf16.gmra.mxu0 %v676_v40  ;;  %1456 = vmatprep.subr.bf16.mxu1 %v1612_v39 }
  0xde   : > { %v582_v48 = vadd.f32 %v550_v46, %v436_v44  ;;  %v583_v49 = vadd.f32 %v551_v47, %v437_v45  ;;  %1457 = vmatpush3.bf16.msra.mxu1 %v1613_v42  ;;  %v632_v46 = vadd.f32 %v1900_v18, %v588_v35  ;;  %v633_v47 = vadd.f32 %v1903_v23, %v589_v36 }
  0xdf   : > { %1458 = vmatprep.subr.bf16.mxu1 %v1614_v50 }
  0xe0   : > { %v626_v51 = vadd.f32 %v1900_v18, %v582_v48  ;;  %v627_v52 = vadd.f32 %v1903_v23, %v583_v49  ;;  %v378_v53 = vpop.permute.xlu1 %377 }
  0xe1   : > { %v438_v63 = vmul.f32 %v1887_v9, %v378_v53  ;;  %v439_v1 = vmul.f32 %v1890_v10, %v378_v53 }
  0xe2   : > { %v659_v56 = vmax.f32 %v627_v52, 0.0  ;;  %v658_v57 = vmax.f32 %v626_v51, 0.0 }
  0xe4   : > { %v679_v58 = vpack.c.bf16 %v659_v56, %v657_v54  ;;  %v678_v59 = vpack.c.bf16 %v658_v57, %v656_v55  ;;  %v716_v56 = vld [vmem:[%s2105_s4] sm:$0x3] }
  0xe5   : > { %v496_v61 = vpop.permute.xlu1 %495 }
  0xe6   : > { %v552_v2 = vmul.f32 %v1881_v7, %v496_v61  ;;  %v553_v3 = vmul.f32 %v1884_v8, %v496_v61  ;;  %970 = vmatprep.mubr.bf16.mxu0 %v679_v58  ;;  %v2001_v58 = vrot.slane %v716_v56, %v1871_v62 }
  0xe7   : > { %971 = vmatmul.mubr.bf16.gmra.mxu0 %v678_v59 }
  0xe8   : > { %v584_v4 = vadd.f32 %v552_v2, %v438_v63  ;;  %v585_v5 = vadd.f32 %v553_v3, %v439_v1 }
  0xe9   : > { %v500_v6 = vpop.permute.xlu1 %499 }
  0xea   : > { %v554_v13 = vmul.f32 %v1881_v7, %v500_v6  ;;  %v555_v14 = vmul.f32 %v1884_v8, %v500_v6  ;;  %v628_v16 = vadd.f32 %v1900_v18, %v584_v4  ;;  %v629_v17 = vadd.f32 %v1903_v23, %v585_v5 }
  0xec   : > { %v586_v19 = vadd.f32 %v554_v13, %v440_v11  ;;  %v587_v20 = vadd.f32 %v555_v14, %v441_v12  ;;  %v661_v31 = vmax.f32 %v629_v17, 0.0  ;;  %v660_v33 = vmax.f32 %v628_v16, 0.0 }
  0xee   : > { %v630_v26 = vadd.f32 %v1900_v18, %v586_v19  ;;  %v631_v27 = vadd.f32 %v1903_v23, %v587_v20  ;;  %v393_v28 = vpop.permute.xlu1 %392 }
  0xef   : > { %v444_v40 = vmul.f32 %v1887_v9, %v393_v28  ;;  %v445_v43 = vmul.f32 %v1890_v10, %v393_v28  ;;  %v1615_v9 = vld [vmem:[#allocation2] sm:$0xff]  }
  0xf0   : > { %v663_v32 = vmax.f32 %v631_v27, 0.0  ;;  %v662_v34 = vmax.f32 %v630_v26, 0.0  ;;  %1459 = vmatpush3.bf16.msra.mxu1 %v1615_v9 }
  0xf2   : > { %v681_v37 = vpack.c.bf16 %v663_v32, %v661_v31  ;;  %v680_v38 = vpack.c.bf16 %v662_v34, %v660_v33 }
  0xf3   : > { %v508_v41 = vpop.permute.xlu1 %507 }
  0xf4   : > { %v558_v44 = vmul.f32 %v1881_v7, %v508_v41  ;;  %v559_v45 = vmul.f32 %v1884_v8, %v508_v41  ;;  %980 = vmatprep.mubr.bf16.mxu0 %v681_v37  ;;  %v664_v7 = vmax.f32 %v632_v46, 0.0  ;;  %v665_v8 = vmax.f32 %v633_v47, 0.0 }
  0xf5   : > { %981 = vmatmul.mubr.bf16.gmra.mxu0 %v680_v38 }
  0xf6   : > { %v590_v48 = vadd.f32 %v558_v44, %v444_v40  ;;  %v591_v49 = vadd.f32 %v559_v45, %v445_v43 }
  0xf8   : > { %v634_v51 = vadd.f32 %v1900_v18, %v590_v48  ;;  %v635_v10 = vadd.f32 %v1903_v23, %v591_v49  ;;  %v2004_v18 = vrot.slane %v716_v56, %v1873_v0 }
  0xfa   : > { %v666_v52 = vmax.f32 %v634_v51, 0.0  ;;  %v667_v53 = vmax.f32 %v635_v10, 0.0 }
  0xfc   : > { %v683_v54 = vpack.c.bf16 %v667_v53, %v665_v8  ;;  %v682_v55 = vpack.c.bf16 %v666_v52, %v664_v7 }
  0xfe   : > { %990 = vmatprep.mubr.bf16.mxu0 %v683_v54 }
  0xff   : > { %991 = vmatmul.mubr.bf16.gmra.mxu0 %v682_v55 }
 0x16d   : > { %v922_v57 = vpop.f32.mrf.mxu0 }
 0x16e   : > { %v923_v63 = vadd.f32 %v922_v57, %v2004_v18 }
 0x16f   : > { %v924_v23 = vpop.f32.mrf.mxu0 }
 0x170   : > { %v925_v60 = vadd.f32 %v924_v23, %v2001_v58  ;;  %v1001_v62 = vmax.f32 %v923_v63, 0.0 }
 0x171   : > { %v926_v59 = vpop.f32.mrf.mxu0 }
 0x172   : > { %v927_v61 = vadd.f32 %v926_v59, %v2004_v18  ;;  %v1002_v4 = vmax.f32 %v925_v60, 0.0 }
 0x173   : > { %v928_v1 = vpop.f32.mrf.mxu0 }
 0x174   : > { %v929_v2 = vadd.f32 %v928_v1, %v2001_v58  ;;  %v1003_v3 = vmax.f32 %v927_v61, 0.0 }
 0x176   : > { %v1004_v5 = vmax.f32 %v929_v2, 0.0  ;;  %v1033_v0 = vpack.c.bf16 %v1003_v3, %v1001_v62 }
 0x177   : > { %v932_v6 = vpop.f32.mrf.mxu0 }
 0x178   : > { %v1034_v12 = vpack.c.bf16 %v1004_v5, %v1002_v4  ;;  %v933_v16 = vadd.f32 %v932_v6, %v2004_v18 }
 0x179   : > { %v934_v11 = vpop.f32.mrf.mxu0 }
 0x17a   : > { %1209 = vmatprep.mubr.bf16.mxu1 %v1034_v12  ;;  %v935_v14 = vadd.f32 %v934_v11, %v2001_v58  ;;  %v1005_v24 = vmax.f32 %v933_v16, 0.0 }
 0x17b   : > { %v936_v13 = vpop.f32.mrf.mxu0  ;;  %1210 = vmatmul.mubr.bf16.vlgmr.msra.gmra.mxu1 %v1033_v0 }
 0x17c   : > { %v937_v15 = vadd.f32 %v936_v13, %v2004_v18  ;;  %v1006_v21 = vmax.f32 %v935_v14, 0.0 }
 0x17d   : > { %v938_v17 = vpop.f32.mrf.mxu0 }
 0x17e   : > { %v939_v19 = vadd.f32 %v938_v17, %v2001_v58  ;;  %v1007_v20 = vmax.f32 %v937_v15, 0.0 }
 0x180   : > { %v1008_v22 = vmax.f32 %v939_v19, 0.0  ;;  %v1035_v26 = vpack.c.bf16 %v1007_v20, %v1005_v24 }
 0x182   : > { %v1036_v25 = vpack.c.bf16 %v1008_v22, %v1006_v21 }
 0x184   : > { %1217 = vmatprep.mubr.bf16.mxu1 %v1036_v25 }
 0x185   : > { %v942_v27 = vpop.f32.mrf.mxu0  ;;  %1218 = vmatmul.mubr.bf16.gmra.mxu1 %v1035_v26 }
 0x186   : > { %v943_v32 = vadd.f32 %v942_v27, %v2004_v18 }
 0x187   : > { %v944_v28 = vpop.f32.mrf.mxu0 }
 0x188   : > { %v945_v30 = vadd.f32 %v944_v28, %v2001_v58  ;;  %v1009_v38 = vmax.f32 %v943_v32, 0.0 }
 0x189   : > { %v946_v29 = vpop.f32.mrf.mxu0 }
 0x18a   : > { %v947_v31 = vadd.f32 %v946_v29, %v2004_v18  ;;  %v1010_v36 = vmax.f32 %v945_v30, 0.0 }
 0x18b   : > { %v948_v33 = vpop.f32.mrf.mxu0 }
 0x18c   : > { %v949_v34 = vadd.f32 %v948_v33, %v2001_v58  ;;  %v1011_v35 = vmax.f32 %v947_v31, 0.0 }
 0x18e   : > { %v1012_v37 = vmax.f32 %v949_v34, 0.0  ;;  %v1037_v41 = vpack.c.bf16 %v1011_v35, %v1009_v38 }
 0x18f   : > { %v952_v39 = vpop.f32.mrf.mxu0 }
 0x190   : > { %v1038_v40 = vpack.c.bf16 %v1012_v37, %v1010_v36  ;;  %v953_v46 = vadd.f32 %v952_v39, %v2004_v18 }
 0x191   : > { %v954_v42 = vpop.f32.mrf.mxu0 }
 0x192   : > { %1225 = vmatprep.mubr.bf16.mxu1 %v1038_v40  ;;  %v955_v44 = vadd.f32 %v954_v42, %v2001_v58  ;;  %v1013_v51 = vmax.f32 %v953_v46, 0.0 }
 0x193   : > { %v956_v43 = vpop.f32.mrf.mxu0  ;;  %1226 = vmatmul.mubr.bf16.gmra.mxu1 %v1037_v41 }
 0x194   : > { %v957_v45 = vadd.f32 %v956_v43, %v2004_v18  ;;  %v1014_v50 = vmax.f32 %v955_v44, 0.0 }
 0x195   : > { %v958_v47 = vpop.f32.mrf.mxu0 }
 0x196   : > { %v959_v48 = vadd.f32 %v958_v47, %v2001_v58  ;;  %v1015_v49 = vmax.f32 %v957_v45, 0.0 }
 0x198   : > { %v1016_v9 = vmax.f32 %v959_v48, 0.0  ;;  %v1039_v7 = vpack.c.bf16 %v1015_v49, %v1013_v51 }
 0x19a   : > { %v1040_v10 = vpack.c.bf16 %v1016_v9, %v1014_v50  ;;  %v2041_v9 = vld [vmem:[%s2107_s6] ss:$0 sm:$0xff] }
 0x19c   : > { %1233 = vmatprep.mubr.bf16.mxu1 %v1040_v10 }
 0x19d   : > { %v962_v8 = vpop.f32.mrf.mxu0  ;;  %1234 = vmatmul.mubr.bf16.gmra.mxu1 %v1039_v7 }
 0x19e   : > { %v963_v56 = vadd.f32 %v962_v8, %v2004_v18 }
 0x19f   : > { %v964_v52 = vpop.f32.mrf.mxu0 }
 0x1a0   : > { %v965_v54 = vadd.f32 %v964_v52, %v2001_v58  ;;  %v1017_v63 = vmax.f32 %v963_v56, 0.0 }
 0x1a1   : > { %v966_v53 = vpop.f32.mrf.mxu0 }
 0x1a2   : > { %v967_v55 = vadd.f32 %v966_v53, %v2004_v18  ;;  %v1018_v60 = vmax.f32 %v965_v54, 0.0 }
 0x1a3   : > { %v968_v57 = vpop.f32.mrf.mxu0 }
 0x1a4   : > { %v969_v23 = vadd.f32 %v968_v57, %v2001_v58  ;;  %v1019_v59 = vmax.f32 %v967_v55, 0.0 }
 0x1a6   : > { %v1020_v61 = vmax.f32 %v969_v23, 0.0  ;;  %v1041_v3 = vpack.c.bf16 %v1019_v59, %v1017_v63 }
 0x1a7   : > { %v972_v1 = vpop.f32.mrf.mxu0 }
 0x1a8   : > { %v1042_v2 = vpack.c.bf16 %v1020_v61, %v1018_v60  ;;  %v973_v11 = vadd.f32 %v972_v1, %v2004_v18 }
 0x1a9   : > { %v974_v4 = vpop.f32.mrf.mxu0 }
 0x1aa   : > { %1241 = vmatprep.mubr.bf16.mxu1 %v1042_v2  ;;  %v975_v6 = vadd.f32 %v974_v4, %v2001_v58  ;;  %v1021_v16 = vmax.f32 %v973_v11, 0.0 }
 0x1ab   : > { %v976_v5 = vpop.f32.mrf.mxu0  ;;  %1242 = vmatmul.mubr.bf16.gmra.mxu1 %v1041_v3 }
 0x1ac   : > { %v977_v62 = vadd.f32 %v976_v5, %v2004_v18  ;;  %v1022_v14 = vmax.f32 %v975_v6, 0.0 }
 0x1ad   : > { %v978_v12 = vpop.f32.mrf.mxu0 }
 0x1ae   : > { %v979_v0 = vadd.f32 %v978_v12, %v2001_v58  ;;  %v1023_v13 = vmax.f32 %v977_v62, 0.0 }
 0x1b0   : > { %v1024_v15 = vmax.f32 %v979_v0, 0.0  ;;  %v1043_v19 = vpack.c.bf16 %v1023_v13, %v1021_v16 }
 0x1b2   : > { %v1044_v17 = vpack.c.bf16 %v1024_v15, %v1022_v14 }
 0x1b4   : > { %1249 = vmatprep.mubr.bf16.mxu1 %v1044_v17 }
 0x1b5   : > { %v982_v20 = vpop.f32.mrf.mxu0  ;;  %1250 = vmatmul.mubr.bf16.gmra.mxu1 %v1043_v19 }
 0x1b6   : > { %v983_v26 = vadd.f32 %v982_v20, %v2004_v18 }
 0x1b7   : > { %v984_v21 = vpop.f32.mrf.mxu0 }
 0x1b8   : > { %v985_v24 = vadd.f32 %v984_v21, %v2001_v58  ;;  %v1025_v32 = vmax.f32 %v983_v26, 0.0 }
 0x1b9   : > { %v986_v22 = vpop.f32.mrf.mxu0 }
 0x1ba   : > { %v987_v25 = vadd.f32 %v986_v22, %v2004_v18  ;;  %v1026_v30 = vmax.f32 %v985_v24, 0.0 }
 0x1bb   : > { %v988_v27 = vpop.f32.mrf.mxu0 }
 0x1bc   : > { %v989_v28 = vadd.f32 %v988_v27, %v2001_v58  ;;  %v1027_v29 = vmax.f32 %v987_v25, 0.0 }
 0x1be   : > { %v1028_v31 = vmax.f32 %v989_v28, 0.0  ;;  %v1045_v35 = vpack.c.bf16 %v1027_v29, %v1025_v32 }
 0x1bf   : > { %v992_v33 = vpop.f32.mrf.mxu0 }
 0x1c0   : > { %v1046_v34 = vpack.c.bf16 %v1028_v31, %v1026_v30  ;;  %v993_v40 = vadd.f32 %v992_v33, %v2004_v18 }
 0x1c1   : > { %v994_v36 = vpop.f32.mrf.mxu0 }
 0x1c2   : > { %1257 = vmatprep.mubr.bf16.mxu1 %v1046_v34  ;;  %v995_v38 = vadd.f32 %v994_v36, %v2001_v58  ;;  %v1029_v46 = vmax.f32 %v993_v40, 0.0 }
 0x1c3   : > { %v996_v37 = vpop.f32.mrf.mxu0  ;;  %1258 = vmatmul.mubr.bf16.gmra.mxu1 %v1045_v35 }
 0x1c4   : > { %v997_v39 = vadd.f32 %v996_v37, %v2004_v18  ;;  %v1030_v44 = vmax.f32 %v995_v38, 0.0 }
 0x1c5   : > { %v998_v41 = vpop.f32.mrf.mxu0 }
 0x1c6   : > { %v999_v42 = vadd.f32 %v998_v41, %v2001_v58  ;;  %v1031_v43 = vmax.f32 %v997_v39, 0.0 }
 0x1c8   : > { %v1032_v45 = vmax.f32 %v999_v42, 0.0  ;;  %v1047_v48 = vpack.c.bf16 %v1031_v43, %v1029_v46 }
 0x1ca   : > { %v1048_v47 = vpack.c.bf16 %v1032_v45, %v1030_v44 }
 0x1cc   : > { %1265 = vmatprep.mubr.bf16.mxu1 %v1048_v47 }
 0x1cd   : > { %1266 = vmatmul.mubr.bf16.gmra.mxu1 %v1047_v48 }
 0x23b   : > { %v1460_v49 = vpop.f32.mrf.mxu1 }
 0x23d   : > { %v1461_v50 = vpop.f32.mrf.mxu1 }
 0x23e   : > { %v1462_v51 = vadd.f32 %v1461_v50, %v1460_v49 }
 0x23f   : > { %v1463_v58 = vpop.f32.mrf.mxu1 }
 0x240   : > { %v1281_v18 = vadd.f32 %v1462_v51, %v2041_v9 }
 0x241   : > { %v1464_v10 = vpop.f32.mrf.mxu1 }
 0x242   : > { %1298 = vst.msk [vmem:[%s2048_s11] sm:$0xff] %vm1297_vm0, %v1281_v18  ;;  %v1465_v7 = vadd.f32 %v1464_v10, %v1463_v58 }
 0x244   : > { %v1282_v8 = vadd.f32 %v1465_v7, %v2041_v9 }
 0x245   : > { %v1466_v52 = vpop.f32.mrf.mxu1 }
 0x246   : > { %1299 = vst.msk [vmem:[%s2048_s11 + $0x8] sm:$0xff] %vm1297_vm0, %v1282_v8 }
 0x247   : > { %v1467_v53 = vpop.f32.mrf.mxu1 }
 0x248   : > { %v1468_v54 = vadd.f32 %v1467_v53, %v1466_v52 }
 0x249   : > { %v1469_v55 = vpop.f32.mrf.mxu1 }
 0x24a   : > { %v1283_v56 = vadd.f32 %v1468_v54, %v2041_v9 }
 0x24b   : > { %v1470_v57 = vpop.f32.mrf.mxu1 }
 0x24c   : > { %1300 = vst.msk [vmem:[%s2048_s11 + $0x10] sm:$0xff] %vm1297_vm0, %v1283_v56  ;;  %v1471_v23 = vadd.f32 %v1470_v57, %v1469_v55 }
 0x24e   : > { %v1284_v59 = vadd.f32 %v1471_v23, %v2041_v9 }
 0x250   : > { %1301 = vst.msk [vmem:[%s2048_s11 + $0x18] sm:$0xff] %vm1297_vm0, %v1284_v59 }
 0x253   : > { %v1472_v60 = vpop.f32.mrf.mxu1 }
 0x255   : > { %v1473_v61 = vpop.f32.mrf.mxu1 }
 0x256   : > { %v1474_v63 = vadd.f32 %v1473_v61, %v1472_v60 }
 0x257   : > { %v1475_v1 = vpop.f32.mrf.mxu1 }
 0x258   : > { %v1285_v2 = vadd.f32 %v1474_v63, %v2041_v9 }
 0x259   : > { %v1476_v3 = vpop.f32.mrf.mxu1 }
 0x25a   : > { %1302 = vst.msk [vmem:[%s2048_s11 + $0x20] sm:$0xff] %vm1297_vm0, %v1285_v2  ;;  %v1477_v4 = vadd.f32 %v1476_v3, %v1475_v1 }
 0x25c   : > { %v1286_v5 = vadd.f32 %v1477_v4, %v2041_v9 }
 0x25d   : > { %v1478_v6 = vpop.f32.mrf.mxu1 }
 0x25e   : > { %1303 = vst.msk [vmem:[%s2048_s11 + $0x28] sm:$0xff] %vm1297_vm0, %v1286_v5 }
 0x25f   : > { %v1479_v62 = vpop.f32.mrf.mxu1 }
 0x260   : > { %v1480_v11 = vadd.f32 %v1479_v62, %v1478_v6 }
 0x261   : > { %v1481_v12 = vpop.f32.mrf.mxu1 }
 0x262   : > { %v1287_v0 = vadd.f32 %v1480_v11, %v2041_v9 }
 0x263   : > { %v1482_v13 = vpop.f32.mrf.mxu1 }
 0x264   : > { %1304 = vst.msk [vmem:[%s2048_s11 + $0x30] sm:$0xff] %vm1297_vm0, %v1287_v0  ;;  %v1483_v14 = vadd.f32 %v1482_v13, %v1481_v12 }
 0x266   : > { %v1288_v15 = vadd.f32 %v1483_v14, %v2041_v9 }
 0x268   : > { %1305 = vst.msk [vmem:[%s2048_s11 + $0x38] sm:$0xff] %vm1297_vm0, %v1288_v15 }
 0x26b   : > { %v1484_v16 = vpop.f32.mrf.mxu1 }
 0x26d   : > { %v1485_v17 = vpop.f32.mrf.mxu1 }
 0x26e   : > { %v1486_v19 = vadd.f32 %v1485_v17, %v1484_v16 }
 0x26f   : > { %v1487_v20 = vpop.f32.mrf.mxu1 }
 0x270   : > { %v1289_v21 = vadd.f32 %v1486_v19, %v2041_v9 }
 0x271   : > { %v1488_v22 = vpop.f32.mrf.mxu1 }
 0x272   : > { %1306 = vst.msk [vmem:[%s2048_s11 + $0x40] sm:$0xff] %vm1297_vm0, %v1289_v21  ;;  %v1489_v24 = vadd.f32 %v1488_v22, %v1487_v20 }
 0x274   : > { %v1290_v25 = vadd.f32 %v1489_v24, %v2041_v9 }
 0x275   : > { %v1490_v26 = vpop.f32.mrf.mxu1 }
 0x276   : > { %1307 = vst.msk [vmem:[%s2048_s11 + $0x48] sm:$0xff] %vm1297_vm0, %v1290_v25 }
 0x277   : > { %v1491_v27 = vpop.f32.mrf.mxu1 }
 0x278   : > { %v1492_v28 = vadd.f32 %v1491_v27, %v1490_v26 }
 0x279   : > { %v1493_v29 = vpop.f32.mrf.mxu1 }
 0x27a   : > { %v1291_v30 = vadd.f32 %v1492_v28, %v2041_v9 }
 0x27b   : > { %v1494_v31 = vpop.f32.mrf.mxu1 }
 0x27c   : > { %1308 = vst.msk [vmem:[%s2048_s11 + $0x50] sm:$0xff] %vm1297_vm0, %v1291_v30  ;;  %v1495_v32 = vadd.f32 %v1494_v31, %v1493_v29 }
 0x27e   : > { %v1292_v33 = vadd.f32 %v1495_v32, %v2041_v9 }
 0x280   : > { %1309 = vst.msk [vmem:[%s2048_s11 + $0x58] sm:$0xff] %vm1297_vm0, %v1292_v33 }
 0x283   : > { %v1496_v34 = vpop.f32.mrf.mxu1 }
 0x285   : > { %v1497_v35 = vpop.f32.mrf.mxu1 }
 0x286   : > { %v1498_v36 = vadd.f32 %v1497_v35, %v1496_v34 }
 0x287   : > { %v1499_v37 = vpop.f32.mrf.mxu1 }
 0x288   : > { %v1293_v38 = vadd.f32 %v1498_v36, %v2041_v9 }
 0x289   : > { %v1500_v39 = vpop.f32.mrf.mxu1 }
 0x28a   : > { %1310 = vst.msk [vmem:[%s2048_s11 + $0x60] sm:$0xff] %vm1297_vm0, %v1293_v38  ;;  %v1501_v40 = vadd.f32 %v1500_v39, %v1499_v37 }
 0x28c   : > { %v1294_v41 = vadd.f32 %v1501_v40, %v2041_v9 }
 0x28d   : > { %v1502_v42 = vpop.f32.mrf.mxu1 }
 0x28e   : > { %1311 = vst.msk [vmem:[%s2048_s11 + $0x68] sm:$0xff] %vm1297_vm0, %v1294_v41 }
 0x28f   : > { %v1503_v43 = vpop.f32.mrf.mxu1 }
 0x290   : > { %v1504_v44 = vadd.f32 %v1503_v43, %v1502_v42 }
 0x291   : > { %v1505_v45 = vpop.f32.mrf.mxu1 }
 0x292   : > { %v1295_v46 = vadd.f32 %v1504_v44, %v2041_v9 }
 0x293   : > { %v1506_v47 = vpop.f32.mrf.mxu1 }
 0x294   : > { %1312 = vst.msk [vmem:[%s2048_s11 + $0x70] sm:$0xff] %vm1297_vm0, %v1295_v46  ;;  %v1507_v48 = vadd.f32 %v1506_v47, %v1505_v45 }
 0x296   : > { %v1296_v49 = vadd.f32 %v1507_v48, %v2041_v9 }
 0x298   : > { %1313 = vst.msk [vmem:[%s2048_s11 + $0x78] sm:$0xff] %vm1297_vm0, %v1296_v49 }
 0x299 PF: > { %s18_s24 = sadd.s32 1, %s1652_s24  }
 0x29a   : > { %p15_p1 = scmp.ge.s32.totalorder %s18_s24, 4  }
 0x29c   :  { %17 = sbr.rel (!%p15_p1) target bundleno = 1 (0x1), region = 83 }
 0x2a1   :  { %1336 = vsyncpa [#allocation3], 1 }
 0x2a2   :  { %1338 = vsyncpa [#allocation3 + $0x1], 1 }

</bundles_post_ra>
